<compile_context>
chip_gen: v5e
topology: v5e:2x2
jax: 0.10.0
libtpu: 0.0.40
codegen_flags: <defaults>
</compile_context>

<pallas_src>
import jax
import jax.numpy as jnp
import numpy as np
from jax.experimental import pallas as pl
from jax.experimental.pallas import tpu as pltpu

# ---------------- synthetic config (matches NFFM's hard-coded column layout) ----
EMB = 8                                   # emb_size
IFS = 8                                   # interactive_field_size (cols 0..7)
INTER_VOCABS = [20, 15, 30, 25, 10, 7, 12, 9]           # interactive_field_max_num_list
NOINTER_VOCABS = [11, 13, 6, 8, 10, 5, 7, 9, 12]        # no_inter fields, cols 9..17
TITLE_SIZE = 50                           # title tokens, cols 18..27
LAYERS = [64, 32, 1]                      # MLP layer sizes
TOTAL_SIZE = 284                          # 28 id cols + 128 video + 128 audio
N_PAIRS = IFS * (IFS + 1) // 2            # 36 second-order interactions
FEAT_DIM = EMB * (IFS + N_PAIRS + 9 + 1) + 256   # 688 — matches the NFFM dim formula
BN_EPS = 1e-5
NCORES = 2            # leading "parallel" grid axis: both TCs on v7x, serial elsewhere


def _round_up(x, m):
    return ((x + m - 1) // m) * m


def _compiler_params():
    return pltpu.CompilerParams(
        dimension_semantics=("parallel", "arbitrary"),
        vmem_limit_bytes=32 * 1024 * 1024)


# -------------------------------- Pallas kernels --------------------------------
def layer1_kernel(feat_ref, w1_ref, h1_ref, stats_ref):
    """feat @ w1 (bias-free, pre-BN) + per-core BN1 sum / sum-of-squares."""
    @pl.when(pl.program_id(1) == 0)
    def _init():
        stats_ref[...] = jnp.zeros_like(stats_ref)

    acc = jnp.dot(feat_ref[...], w1_ref[...], preferred_element_type=jnp.float32)
    h1_ref[...] = acc.astype(h1_ref.dtype)           # bf16 activation store
    ss = jnp.concatenate([jnp.sum(acc, axis=0, keepdims=True),
                          jnp.sum(acc * acc, axis=0, keepdims=True)], axis=0)
    stats_ref[...] += ss[None]                       # zero pad-rows contribute 0 here


def make_layer2_kernel(tb, nt, true_b, need_mask):
    """Apply BN1 (global batch stats), layer 2, per-core BN2 partial stats."""
    def layer2_kernel(h1_ref, bn1_ref, w2_ref, h2_ref, stats_ref):
        @pl.when(pl.program_id(1) == 0)
        def _init():
            stats_ref[...] = jnp.zeros_like(stats_ref)

        bn1 = bn1_ref[...]                                            # [2, 64]
        hn1 = h1_ref[...].astype(jnp.float32) * bn1[0:1, :] + bn1[1:2, :]
        h2 = jnp.dot(hn1.astype(jnp.bfloat16), w2_ref[...],
                     preferred_element_type=jnp.float32)
        h2_ref[...] = h2.astype(h2_ref.dtype)
        if need_mask:   # pad rows would otherwise contribute shift1 @ w2 to the stats
            tile = pl.program_id(0) * nt + pl.program_id(1)
            rows = tile * tb + jax.lax.broadcasted_iota(jnp.int32, (tb, 1), 0)
            h2 = jnp.where(rows < true_b, h2, 0.0)
        ss = jnp.concatenate([jnp.sum(h2, axis=0, keepdims=True),
                              jnp.sum(h2 * h2, axis=0, keepdims=True)], axis=0)
        stats_ref[...] += ss[None]
    return layer2_kernel


# ------------------------------ glue (gathers, prep) -----------------------------
def build_features(x, params):
    """Embedding gathers, pair products, title pooling, feature concat (plain JAX).

    TODO(synk): the per-column embedding-table gathers are data-dependent lookups
    into tiny tables; they stay in XLA rather than a Pallas DMA-gather.
    """
    idx = x[:, :28].astype(jnp.int32)
    one = jnp.concatenate([params['emb1'][i][idx[:, i]] for i in range(IFS)], axis=1)
    pair_list, inc = [], 0
    for i in range(IFS):
        for j in range(i, IFS):
            pair_list.append(params['pair_first'][inc][idx[:, i]] *
                             params['pair_second'][inc][idx[:, j]])
            inc += 1
    pair = jnp.concatenate(pair_list, axis=1)                         # [B, 288]
    no = jnp.concatenate([params['emb3'][i][idx[:, i + 9]] for i in range(9)], axis=1)
    title = jnp.sum(params['title'][idx[:, 18:28]], axis=1)           # [B, 8]
    va = x[:, 28:].astype(jnp.float32)                                # [B, 256]
    # Same column order as the PyTorch concat: one | pair | no_inter | title | va.
    return jnp.concatenate([one, pair, no, title, va], axis=1)        # [B, 688]


def prepare_params(params):
    """One-time parameter prep: hoists the bf16 weight casts out of the forward."""
    p = dict(params)
    p['w1_bf16'] = params['w1'].astype(jnp.bfloat16)
    p['w2_bf16'] = params['w2'].astype(jnp.bfloat16)
    return p


def nffm_forward(x, params, tb=512):
    B = x.shape[0]
    f32, bf16 = jnp.float32, jnp.bfloat16

    # Batch tiling: NCORES parallel blocks x nt "arbitrary" tiles of tb rows each.
    cap = _round_up(-(-B // NCORES), 16)
    tb = _round_up(max(16, min(tb, cap)), 16)
    nt = -(-B // (NCORES * tb))
    padded_b = NCORES * tb * nt
    pad = padded_b - B

    feat = build_features(x, params).astype(bf16)                     # [B, 688]
    if pad:
        feat = jnp.pad(feat, ((0, pad), (0, 0)))                      # zero pad rows

    w1 = params['w1_bf16'] if 'w1_bf16' in params else params['w1'].astype(bf16)
    w2 = params['w2_bf16'] if 'w2_bf16' in params else params['w2'].astype(bf16)

    batch_tile = lambda last: pl.BlockSpec((tb, last), lambda c, i: (c * nt + i, 0))
    const2d = lambda shape: pl.BlockSpec(shape, lambda c, i: (0, 0))
    stats_spec = lambda n: pl.BlockSpec((1, 2, n), lambda c, i: (c, 0, 0))

    # ---- pass 1: feat @ w1, per-core BN1 sum / sum-of-squares ------------------
    h1, stats1 = pl.pallas_call(
        layer1_kernel,
        grid=(NCORES, nt),
        in_specs=[batch_tile(FEAT_DIM), const2d((FEAT_DIM, LAYERS[0]))],
        out_specs=[batch_tile(LAYERS[0]), stats_spec(LAYERS[0])],
        out_shape=[jax.ShapeDtypeStruct((padded_b, LAYERS[0]), bf16),
                   jax.ShapeDtypeStruct((NCORES, 2, LAYERS[0]), f32)],
        compiler_params=_compiler_params(),
    )(feat, w1)

    n = jnp.float32(B)
    s1 = jnp.sum(stats1, axis=0)                         # reduce per-core partials
    mean1 = s1[0] / n
    var1 = jnp.maximum(s1[1] / n - mean1 * mean1, 0.0)   # clamp one-pass variance
    scale1 = params['g1'] * jax.lax.rsqrt(var1 + BN_EPS)
    shift1 = params['be1'] - mean1 * scale1              # b1 cancels exactly in BN
    bn1 = jnp.stack([scale1, shift1], axis=0)            # [2, 64] f32

    # ---- pass 2: BN1 + layer 2, per-core BN2 sum / sum-of-squares --------------
    h2, stats2 = pl.pallas_call(
        make_layer2_kernel(tb, nt, B, pad > 0),
        grid=(NCORES, nt),
        in_specs=[batch_tile(LAYERS[0]), const2d((2, LAYERS[0])),
                  const2d((LAYERS[0], LAYERS[1]))],
        out_specs=[batch_tile(LAYERS[1]), stats_spec(LAYERS[1])],
        out_shape=[jax.ShapeDtypeStruct((padded_b, LAYERS[1]), bf16),
                   jax.ShapeDtypeStruct((NCORES, 2, LAYERS[1]), f32)],
        compiler_params=_compiler_params(),
    )(h1, bn1, w2)

    s2 = jnp.sum(stats2, axis=0)
    mean2 = s2[0] / n
    var2 = jnp.maximum(s2[1] / n - mean2 * mean2, 0.0)
    scale2 = params['g2'] * jax.lax.rsqrt(var2 + BN_EPS)
    shift2 = params['be2'] - mean2 * scale2              # b2 cancels exactly in BN

    # ---- tail: BN2 + final [32]->1 linear + sigmoid — trivial, left to XLA ----
    hn2 = h2[:B].astype(f32) * scale2 + shift2
    return jax.nn.sigmoid(hn2 @ params['w3'] + params['b3'])          # [B, 1]


# ------------------------------ pure-JAX reference ------------------------------
def nffm_reference(x, params):
    feat = build_features(x, params)
    h = feat @ params['w1'] + params['b1']
    m = jnp.mean(h, axis=0, keepdims=True); v = jnp.mean((h - m) ** 2, axis=0, keepdims=True)
    h = params['g1'] * (h - m) / jnp.sqrt(v + BN_EPS) + params['be1']
    h = h @ params['w2'] + params['b2']
    m = jnp.mean(h, axis=0, keepdims=True); v = jnp.mean((h - m) ** 2, axis=0, keepdims=True)
    h = params['g2'] * (h - m) / jnp.sqrt(v + BN_EPS) + params['be2']
    h = h @ params['w3'] + params['b3']
    return jax.nn.sigmoid(h)


# ------------------------------ deterministic params ----------------------------
def init_params(key):
    keys = iter(jax.random.split(key, 256))
    nrm = lambda shape, s=0.1: jax.random.normal(next(keys), shape, jnp.float32) * s
    params = {}
    params['emb1'] = [nrm((v, EMB)) for v in INTER_VOCABS]
    pf, ps = [], []
    for i in range(IFS):
        for j in range(i, IFS):
            pf.append(nrm((INTER_VOCABS[i], EMB)))
            ps.append(nrm((INTER_VOCABS[j], EMB)))
    params['pair_first'], params['pair_second'] = pf, ps
    params['emb3'] = [nrm((v, EMB)) for v in NOINTER_VOCABS]
    params['title'] = nrm((TITLE_SIZE, EMB))
    dims = [FEAT_DIM] + LAYERS                             # [688, 64, 32, 1]
    params['w1'] = nrm((dims[0], dims[1]));  params['b1'] = nrm((dims[1],))
    params['g1'] = 1.0 + nrm((dims[1],), 0.05); params['be1'] = nrm((dims[1],))
    params['w2'] = nrm((dims[1], dims[2]));  params['b2'] = nrm((dims[2],))
    params['g2'] = 1.0 + nrm((dims[2],), 0.05); params['be2'] = nrm((dims[2],))
    params['w3'] = nrm((dims[2], dims[3]));  params['b3'] = nrm((dims[3],))
    return params


if __name__ == "__main__":
    key = jax.random.PRNGKey(0)
    kp, kx_ids, kx_dense = jax.random.split(key, 3)
    params = prepare_params(init_params(kp))

    # B not a multiple of the tile -> exercises zero-padding, the masked pass-2
    # stats, multi-tile BN accumulation per core, and the 2-way core-parallel axis.
    B = 200
    # id column vocab sizes: 8 interactive | 1 unused (col 8) | 9 no-inter | 10 title
    max_ids = INTER_VOCABS + [1] + NOINTER_VOCABS + [TITLE_SIZE] * 10
    ids = jnp.stack(
        [jax.random.randint(jax.random.fold_in(kx_ids, c), (B,), 0, m)
         for c, m in enumerate(max_ids)], axis=1).astype(jnp.float32)
    dense = jax.random.normal(kx_dense, (B, TOTAL_SIZE - 28), jnp.float32)
    x = jnp.concatenate([ids, dense], axis=1)              # [B, 284]

    fwd = jax.jit(nffm_forward, static_argnames=('tb',))
    # tb=64 keeps the demo small; production default is tb=512 (see nffm_forward).
    y = jax.block_until_ready(fwd(x, params, tb=64))
    y_ref = np.array(nffm_reference(x, params))
    assert y.shape == (B, 1)
    np.testing.assert_allclose(np.array(y), y_ref, rtol=2e-2, atol=2e-2)
    print("KERNEL_OK")
</pallas_src>

<mosaic_0001>
module attributes {stable_mosaic.version = 11 : i64} {
  func.func @layer1_kernel(%arg0: i32, %arg1: i32, %arg2: memref<64x688xbf16, #tpu.memory_space<vmem>>, %arg3: memref<688x64xbf16, #tpu.memory_space<vmem>>, %arg4: memref<64x64xbf16, #tpu.memory_space<vmem>>, %arg5: memref<1x2x64xf32, #tpu.memory_space<vmem>>) attributes {dimension_semantics = [#tpu.dimension_semantics<parallel>, #tpu.dimension_semantics<arbitrary>], iteration_bounds = array<i64: 2, 2>, scalar_prefetch = 0 : i64, scratch_operands = 0 : i64, tpu.core_type = #tpu.core_type<tc>, window_params = [{transform_indices = @transform_0, window_bounds = array<i64: 64, 688>}, {pipeline_mode = #tpu.pipeline_mode<synchronous>, transform_indices = @transform_1, window_bounds = array<i64: 688, 64>}, {transform_indices = @transform_2, window_bounds = array<i64: 64, 64>}, {transform_indices = @transform_3, window_bounds = array<i64: 1, 2, 64>}]} {
    %c0_i32 = arith.constant 0 : i32
    %0 = arith.cmpi eq, %arg1, %c0_i32 : i32
    %1 = arith.extui %0 : i1 to i32
    %c0_i32_0 = arith.constant 0 : i32
    %2 = arith.cmpi ne, %1, %c0_i32_0 : i32
    scf.if %2 {
      %cst_14 = arith.constant 0.000000e+00 : f32
      %18 = vector.broadcast %cst_14 : f32 to vector<1x2x64xf32>
      %c0_15 = arith.constant 0 : index
      %c0_16 = arith.constant 0 : index
      %c0_17 = arith.constant 0 : index
      %19 = vector.load %arg5[%c0_15, %c0_16, %c0_17] : memref<1x2x64xf32, #tpu.memory_space<vmem>>, vector<1x2x64xf32>
      tpu.vector_store %arg5[%c0_15, %c0_16, %c0_17], %18 {strides = array<i32>} : memref<1x2x64xf32, #tpu.memory_space<vmem>>, vector<1x2x64xf32>,
    } else {
    }
    %c0 = arith.constant 0 : index
    %c0_1 = arith.constant 0 : index
    %3 = vector.load %arg2[%c0, %c0_1] : memref<64x688xbf16, #tpu.memory_space<vmem>>, vector<64x688xbf16>
    %c0_2 = arith.constant 0 : index
    %c0_3 = arith.constant 0 : index
    %4 = vector.load %arg3[%c0_2, %c0_3] : memref<688x64xbf16, #tpu.memory_space<vmem>>, vector<688x64xbf16>
    %cst = arith.constant dense<0.000000e+00> : vector<64x64xf32>
    %5 = tpu.matmul %3, %4, %cst {dimension_numbers = #tpu.dot_dimension_numbers<[1], [0], [0], [1], [0, 0, 1, 1], [], []>} : vector<64x688xbf16>, vector<688x64xbf16>, vector<64x64xf32> -> vector<64x64xf32>
    %6 = arith.truncf %5 : vector<64x64xf32> to vector<64x64xbf16>
    %c0_4 = arith.constant 0 : index
    %c0_5 = arith.constant 0 : index
    %7 = vector.load %arg4[%c0_4, %c0_5] : memref<64x64xbf16, #tpu.memory_space<vmem>>, vector<64x64xbf16>
    tpu.vector_store %arg4[%c0_4, %c0_5], %6 {strides = array<i32>} : memref<64x64xbf16, #tpu.memory_space<vmem>>, vector<64x64xbf16>,
    %cst_6 = arith.constant dense<0.000000e+00> : vector<64xf32>
    %8 = vector.multi_reduction <add>, %5, %cst_6 [0] : vector<64x64xf32> to vector<64xf32>
    %9 = vector.shape_cast %8 : vector<64xf32> to vector<1x64xf32>
    %10 = arith.mulf %5, %5 : vector<64x64xf32>
    %cst_7 = arith.constant dense<0.000000e+00> : vector<64xf32>
    %11 = vector.multi_reduction <add>, %10, %cst_7 [0] : vector<64x64xf32> to vector<64xf32>
    %12 = vector.shape_cast %11 : vector<64xf32> to vector<1x64xf32>
    %13 = tpu.concatenate %9, %12 in 0 : vector<1x64xf32>, vector<1x64xf32> -> vector<2x64xf32>
    %c0_8 = arith.constant 0 : index
    %c0_9 = arith.constant 0 : index
    %c0_10 = arith.constant 0 : index
    %14 = vector.load %arg5[%c0_8, %c0_9, %c0_10] : memref<1x2x64xf32, #tpu.memory_space<vmem>>, vector<1x2x64xf32>
    %15 = vector.shape_cast %13 : vector<2x64xf32> to vector<1x2x64xf32>
    %16 = arith.addf %14, %15 : vector<1x2x64xf32>
    %c0_11 = arith.constant 0 : index
    %c0_12 = arith.constant 0 : index
    %c0_13 = arith.constant 0 : index
    %17 = vector.load %arg5[%c0_11, %c0_12, %c0_13] : memref<1x2x64xf32, #tpu.memory_space<vmem>>, vector<1x2x64xf32>
    tpu.vector_store %arg5[%c0_11, %c0_12, %c0_13], %16 {strides = array<i32>} : memref<1x2x64xf32, #tpu.memory_space<vmem>>, vector<1x2x64xf32>,
    return
  }
  func.func @transform_0(%arg0: i32, %arg1: i32) -> (i32, i32) {
    %c2_i32 = arith.constant 2 : i32
    %0 = arith.muli %arg0, %c2_i32 : i32
    %1 = arith.addi %0, %arg1 : i32
    %c0_i32 = arith.constant 0 : i32
    %c0_i32_0 = arith.constant 0 : i32
    return %1, %c0_i32 : i32, i32
  }
  func.func @transform_1(%arg0: i32, %arg1: i32) -> (i32, i32) {
    %c0_i32 = arith.constant 0 : i32
    %c0_i32_0 = arith.constant 0 : i32
    %c0_i32_1 = arith.constant 0 : i32
    return %c0_i32, %c0_i32_0 : i32, i32
  }
  func.func @transform_2(%arg0: i32, %arg1: i32) -> (i32, i32) {
    %c2_i32 = arith.constant 2 : i32
    %0 = arith.muli %arg0, %c2_i32 : i32
    %1 = arith.addi %0, %arg1 : i32
    %c0_i32 = arith.constant 0 : i32
    %c0_i32_0 = arith.constant 0 : i32
    return %1, %c0_i32 : i32, i32
  }
  func.func @transform_3(%arg0: i32, %arg1: i32) -> (i32, i32, i32) {
    %c0_i32 = arith.constant 0 : i32
    %c0_i32_0 = arith.constant 0 : i32
    %c0_i32_1 = arith.constant 0 : i32
    return %arg0, %c0_i32, %c0_i32_0 : i32, i32, i32
  }
}

module attributes {stable_mosaic.version = 11 : i64} {
  func.func @layer2_kernel(%arg0: i32, %arg1: i32, %arg2: memref<64x64xbf16, #tpu.memory_space<vmem>>, %arg3: memref<2x64xf32, #tpu.memory_space<vmem>>, %arg4: memref<64x32xbf16, #tpu.memory_space<vmem>>, %arg5: memref<64x32xbf16, #tpu.memory_space<vmem>>, %arg6: memref<1x2x32xf32, #tpu.memory_space<vmem>>) attributes {dimension_semantics = [#tpu.dimension_semantics<parallel>, #tpu.dimension_semantics<arbitrary>], iteration_bounds = array<i64: 2, 2>, scalar_prefetch = 0 : i64, scratch_operands = 0 : i64, tpu.core_type = #tpu.core_type<tc>, window_params = [{transform_indices = @transform_0, window_bounds = array<i64: 64, 64>}, {pipeline_mode = #tpu.pipeline_mode<synchronous>, transform_indices = @transform_1, window_bounds = array<i64: 2, 64>}, {pipeline_mode = #tpu.pipeline_mode<synchronous>, transform_indices = @transform_2, window_bounds = array<i64: 64, 32>}, {transform_indices = @transform_3, window_bounds = array<i64: 64, 32>}, {transform_indices = @transform_4, window_bounds = array<i64: 1, 2, 32>}]} {
    %c0_i32 = arith.constant 0 : i32
    %0 = arith.cmpi eq, %arg1, %c0_i32 : i32
    %1 = arith.extui %0 : i1 to i32
    %c0_i32_0 = arith.constant 0 : i32
    %2 = arith.cmpi ne, %1, %c0_i32_0 : i32
    scf.if %2 {
      %cst_17 = arith.constant 0.000000e+00 : f32
      %39 = vector.broadcast %cst_17 : f32 to vector<1x2x32xf32>
      %c0_18 = arith.constant 0 : index
      %c0_19 = arith.constant 0 : index
      %c0_20 = arith.constant 0 : index
      %40 = vector.load %arg6[%c0_18, %c0_19, %c0_20] : memref<1x2x32xf32, #tpu.memory_space<vmem>>, vector<1x2x32xf32>
      tpu.vector_store %arg6[%c0_18, %c0_19, %c0_20], %39 {strides = array<i32>} : memref<1x2x32xf32, #tpu.memory_space<vmem>>, vector<1x2x32xf32>,
    } else {
    }
    %c0 = arith.constant 0 : index
    %c0_1 = arith.constant 0 : index
    %3 = vector.load %arg3[%c0, %c0_1] : memref<2x64xf32, #tpu.memory_space<vmem>>, vector<2x64xf32>
    %c0_2 = arith.constant 0 : index
    %c0_3 = arith.constant 0 : index
    %4 = vector.load %arg2[%c0_2, %c0_3] : memref<64x64xbf16, #tpu.memory_space<vmem>>, vector<64x64xbf16>
    %5 = arith.extf %4 : vector<64x64xbf16> to vector<64x64xf32>
    %6 = vector.extract_strided_slice %3 {offsets = [0, 0], sizes = [1, 64], strides = [1, 1]} : vector<2x64xf32> to vector<1x64xf32>
    %7 = vector.broadcast %6 : vector<1x64xf32> to vector<64x64xf32>
    %8 = arith.mulf %5, %7 : vector<64x64xf32>
    %9 = vector.extract_strided_slice %3 {offsets = [1, 0], sizes = [1, 64], strides = [1, 1]} : vector<2x64xf32> to vector<1x64xf32>
    %10 = vector.broadcast %9 : vector<1x64xf32> to vector<64x64xf32>
    %11 = arith.addf %8, %10 : vector<64x64xf32>
    %12 = arith.truncf %11 : vector<64x64xf32> to vector<64x64xbf16>
    %c0_4 = arith.constant 0 : index
    %c0_5 = arith.constant 0 : index
    %13 = vector.load %arg4[%c0_4, %c0_5] : memref<64x32xbf16, #tpu.memory_space<vmem>>, vector<64x32xbf16>
    %cst = arith.constant dense<0.000000e+00> : vector<64x32xf32>
    %14 = tpu.matmul %12, %13, %cst {dimension_numbers = #tpu.dot_dimension_numbers<[1], [0], [0], [1], [0, 0, 1, 1], [], []>} : vector<64x64xbf16>, vector<64x32xbf16>, vector<64x32xf32> -> vector<64x32xf32>
    %15 = arith.truncf %14 : vector<64x32xf32> to vector<64x32xbf16>
    %c0_6 = arith.constant 0 : index
    %c0_7 = arith.constant 0 : index
    %16 = vector.load %arg5[%c0_6, %c0_7] : memref<64x32xbf16, #tpu.memory_space<vmem>>, vector<64x32xbf16>
    tpu.vector_store %arg5[%c0_6, %c0_7], %15 {strides = array<i32>} : memref<64x32xbf16, #tpu.memory_space<vmem>>, vector<64x32xbf16>,
    %c2_i32 = arith.constant 2 : i32
    %17 = arith.muli %arg0, %c2_i32 : i32
    %18 = arith.addi %17, %arg1 : i32
    %c64_i32 = arith.constant 64 : i32
    %19 = arith.muli %18, %c64_i32 : i32
    %20 = tpu.iota {dimensions = array<i32: 0>} : vector<64x1xi32>
    %21 = vector.broadcast %19 : i32 to vector<64x1xi32>
    %22 = arith.addi %21, %20 : vector<64x1xi32>
    %c200_i32 = arith.constant 200 : i32
    %23 = vector.broadcast %c200_i32 : i32 to vector<64x1xi32>
    %24 = arith.cmpi slt, %22, %23 : vector<64x1xi32>
    %cst_8 = arith.constant 0.000000e+00 : f32
    %25 = vector.shape_cast %24 : vector<64x1xi1> to vector<64x1xi1>
    %26 = vector.broadcast %25 : vector<64x1xi1> to vector<64x32xi1>
    %27 = vector.broadcast %cst_8 : f32 to vector<64x32xf32>
    %28 = arith.select %26, %14, %27 : vector<64x32xi1>, vector<64x32xf32>
    %cst_9 = arith.constant dense<0.000000e+00> : vector<32xf32>
    %29 = vector.multi_reduction <add>, %28, %cst_9 [0] : vector<64x32xf32> to vector<32xf32>
    %30 = vector.shape_cast %29 : vector<32xf32> to vector<1x32xf32>
    %31 = arith.mulf %28, %28 : vector<64x32xf32>
    %cst_10 = arith.constant dense<0.000000e+00> : vector<32xf32>
    %32 = vector.multi_reduction <add>, %31, %cst_10 [0] : vector<64x32xf32> to vector<32xf32>
    %33 = vector.shape_cast %32 : vector<32xf32> to vector<1x32xf32>
    %34 = tpu.concatenate %30, %33 in 0 : vector<1x32xf32>, vector<1x32xf32> -> vector<2x32xf32>
    %c0_11 = arith.constant 0 : index
    %c0_12 = arith.constant 0 : index
    %c0_13 = arith.constant 0 : index
    %35 = vector.load %arg6[%c0_11, %c0_12, %c0_13] : memref<1x2x32xf32, #tpu.memory_space<vmem>>, vector<1x2x32xf32>
    %36 = vector.shape_cast %34 : vector<2x32xf32> to vector<1x2x32xf32>
    %37 = arith.addf %35, %36 : vector<1x2x32xf32>
    %c0_14 = arith.constant 0 : index
    %c0_15 = arith.constant 0 : index
    %c0_16 = arith.constant 0 : index
    %38 = vector.load %arg6[%c0_14, %c0_15, %c0_16] : memref<1x2x32xf32, #tpu.memory_space<vmem>>, vector<1x2x32xf32>
    tpu.vector_store %arg6[%c0_14, %c0_15, %c0_16], %37 {strides = array<i32>} : memref<1x2x32xf32, #tpu.memory_space<vmem>>, vector<1x2x32xf32>,
    return
  }
  func.func @transform_0(%arg0: i32, %arg1: i32) -> (i32, i32) {
    %c2_i32 = arith.constant 2 : i32
    %0 = arith.muli %arg0, %c2_i32 : i32
    %1 = arith.addi %0, %arg1 : i32
    %c0_i32 = arith.constant 0 : i32
    %c0_i32_0 = arith.constant 0 : i32
    return %1, %c0_i32 : i32, i32
  }
  func.func @transform_1(%arg0: i32, %arg1: i32) -> (i32, i32) {
    %c0_i32 = arith.constant 0 : i32
    %c0_i32_0 = arith.constant 0 : i32
    %c0_i32_1 = arith.constant 0 : i32
    return %c0_i32, %c0_i32_0 : i32, i32
  }
  func.func @transform_2(%arg0: i32, %arg1: i32) -> (i32, i32) {
    %c0_i32 = arith.constant 0 : i32
    %c0_i32_0 = arith.constant 0 : i32
    %c0_i32_1 = arith.constant 0 : i32
    return %c0_i32, %c0_i32_0 : i32, i32
  }
  func.func @transform_3(%arg0: i32, %arg1: i32) -> (i32, i32) {
    %c2_i32 = arith.constant 2 : i32
    %0 = arith.muli %arg0, %c2_i32 : i32
    %1 = arith.addi %0, %arg1 : i32
    %c0_i32 = arith.constant 0 : i32
    %c0_i32_0 = arith.constant 0 : i32
    return %1, %c0_i32 : i32, i32
  }
  func.func @transform_4(%arg0: i32, %arg1: i32) -> (i32, i32, i32) {
    %c0_i32 = arith.constant 0 : i32
    %c0_i32_0 = arith.constant 0 : i32
    %c0_i32_1 = arith.constant 0 : i32
    return %arg0, %c0_i32, %c0_i32_0 : i32, i32, i32
  }
}

</mosaic_0001>

<bundles_post_ra>
// kernel: nffm_forward.3
= control target key start
LH: loop header
LB: loop body
LE: loop exit
PB: predicated region body
PF: predicated region fallthrough
CT: control target
= control target key end

     0   :  { %s783_s15 = smov 0   ;;  %s785_s16 = smov 0   ;;  %s897_s0 = inlined_call_operand.vmem [shape: bf16[256,64], index: 0, kind: input, shape index: {}]   ;;  %s898_s1 = inlined_call_operand.vmem [shape: f32[2,64], index: 1, kind: input, shape index: {}]   ;;  %s899_s2 = inlined_call_operand.vmem [shape: bf16[64,32], index: 2, kind: input, shape index: {}]   ;;  %s900_s3 = inlined_call_operand.vmem [shape: bf16[256,32], index: 3, kind: output, shape index: {0}]   ;;  %s901_s4 = inlined_call_operand.vmem [shape: f32[2,2,32], index: 4, kind: output, shape index: {1}]  }
   0x1   :  { %s787_s17 = smov 0   ;;  %s789_s18 = smov 0  }
   0x2   :  { %s791_s19 = smov 0  }
   0x3 LB: > { %s24_s20 = sadd.s32 1, %s747_s17  ;;  %s27_s21 = sadd.s32 1, %s751_s18  ;;  %s755_s19 = sphi %s791_s19, %s15_s19   ;;  %s751_s18 = sphi %s789_s18, %s905_s18   ;;  %s747_s17 = sphi %s787_s17, %s904_s17   ;;  %s743_s16 = sphi %s785_s16, %s903_s16   ;;  %s739_s15 = sphi %s783_s15, %s902_s15  }
   0x4   : > { %p25_p0 = scmp.ge.s32.totalorder %s24_s20, 2  ;;  %p608_p1 = scmp.ge.s32.totalorder %s755_s19, 1 }
   0x5   : > { %p190_p2 = scmp.lt.s32.totalorder %s755_s19, 5 }
   0x6   : > { %s907_s20 = smov (%p25_p0, %s24_s20), 0  ;;  %s909_s21 = smov (!%p25_p0, %s27_s21), %s751_s18 }
   0x7   : > { %p191_p3 = pnand %p608_p1, %p190_p2  ;;  %p29_p4 = scmp.ge.s32.totalorder %s909_s21, 2 }
   0x8   : > { %s609_s22 = sshll.u32 (!%p191_p3), %s743_s16, 1  ;;  %p244_p5 = scmp.lt.s32.totalorder (!%p191_p3), %s743_s16, 1 }
   0x9   : > { %s911_s21 = smov (%p29_p4, %s909_s21), 0  ;;  %194 = sbr.rel (%p191_p3) target bundleno = 208 (0xd0), region = 32 }
   0xa   : > { %s813_s23 = sadd.s32 (!%p191_p3), %s739_s15, %s609_s22  ;;  %p616_p7 = scmp.ne.s32.totalorder (!%p191_p3), %s739_s15, 0 }
   0xb   : > { %s610_s24 = sshll.u32 (!%p191_p3), %s813_s23, 3 }
   0xc   : > { %p227_p6 = scmp.lt.s32.totalorder (!%p191_p3), %s610_s24, 31 }
   0xe   : > { %s913_s16 = smov (!%p244_p5, %s743_s16), 1  ;;  %s915_s24 = smov (!%p227_p6, %s610_s24), 31 }
   0xf   : > { %s615_s25 = sshll.u32 %s913_s16, 1  ;;  %s611_s26 = sshll.u32 %s915_s24, 2 }
  0x10   : > { %s819_s29 = scalar_lea.vmem %s901_s4, %s615_s25  ;;  %s230_s6 = scalar_lea.vmem %s897_s0, %s611_s26 }
  0x11   : > { %s827_s9 = scalar_lea.vmem %s900_s3, %s611_s26  ;;  %252 = sbr.rel (%p616_p7) target bundleno = 24 (0x18), region = 36 }
  0x16   : > { %vm253_vm0 = vcmask 254976   ;;  %v757_v0 = vmov 0.0  }
  0x17   : > { %254 = vst.msk [vmem:[%s819_s29] sm:$0x3] %vm253_vm0, %v757_v0 }
  0x18 PF: > { %v644_v1 = vld [vmem:[%s899_s2 + $0x18] sm:$0xff]  ;;  %v643_v2 = vld [vmem:[%s899_s2 + $0x10] sm:$0xff]  ;;  %v255_v3 = vld [vmem:[%s898_s1] sm:$0x3]  ;;  %vm326_vm1 = vcmask 523264   ;;  %v388_v40 = vlaneseq  ;;  %s638_s26 = sshll.u32 %s813_s23, 6 }
  0x19   : > { %v646_v4 = vld [vmem:[%s230_s6] sm:$0xff]   ;;  %343 = vmatpush.bf16.msra.mxu0 %v644_v1  ;;  %664 = vmatpush.bf16.msra.mxu1 %v644_v1  ;;  %v272_v7 = vperm.slane %v255_v3, 0  ;;  %v661_v8 = vld [vmem:[%s230_s6 + $0x8] sm:$0xff]   ;;  %v662_v9 = vld [vmem:[%s230_s6 + $0x10] sm:$0xff]   ;;  %v281_v16 = vperm.slane %v255_v3, 1  ;;  %v397_v42 = vstv %s638_s26  ;;  %vm376_vm2 = vcmask 257024  }
  0x1a   : > { %v647_v5 = vunpack.c.l.bf16 %v646_v4  ;;  %v648_v6 = vunpack.c.h.bf16 %v646_v4  ;;  %v663_v10 = vld [vmem:[%s230_s6 + $0x18] sm:$0xff]   ;;  %665 = vmatpush.bf16.msra.mxu2 %v644_v1  ;;  %666 = vmatpush.bf16.msra.mxu3 %v644_v1  ;;  %v651_v11 = vunpack.c.l.bf16 %v661_v8  ;;  %v652_v12 = vunpack.c.h.bf16 %v661_v8  ;;  %v642_v23 = vld [vmem:[%s899_s2 + $0x8] sm:$0xff]  ;;  %v641_v32 = vld [vmem:[%s899_s2] sm:$0xff] }
  0x1b   : > { %v655_v13 = vunpack.c.l.bf16 %v662_v9  ;;  %v656_v14 = vunpack.c.h.bf16 %v662_v9  ;;  %v659_v17 = vunpack.c.l.bf16 %v663_v10  ;;  %v660_v18 = vunpack.c.h.bf16 %v663_v10 }
  0x1c   : > { %v273_v15 = vmul.f32 %v647_v5, %v272_v7  ;;  %v274_v19 = vmul.f32 %v648_v6, %v272_v7  ;;  %v275_v20 = vmul.f32 %v651_v11, %v272_v7  ;;  %v276_v21 = vmul.f32 %v652_v12, %v272_v7 }
  0x1d   : > { %v277_v22 = vmul.f32 %v655_v13, %v272_v7  ;;  %344 = vmatpush.bf16.msra.mxu0 %v643_v2  ;;  %667 = vmatpush.bf16.msra.mxu1 %v643_v2  ;;  %v278_v24 = vmul.f32 %v656_v14, %v272_v7  ;;  %v279_v25 = vmul.f32 %v659_v17, %v272_v7  ;;  %v389_v41 = vshrl.u32 %v388_v40, 7 }
  0x1e   : > { %668 = vmatpush.bf16.msra.mxu2 %v643_v2  ;;  %669 = vmatpush.bf16.msra.mxu3 %v643_v2  ;;  %v282_v26 = vadd.f32 %v281_v16, %v273_v15  ;;  %v280_v27 = vmul.f32 %v660_v18, %v272_v7  ;;  %v283_v28 = vadd.f32 %v281_v16, %v274_v19  ;;  %vm438_vm5 = vcmask 261120  }
  0x1f   : > { %v284_v29 = vadd.f32 %v281_v16, %v275_v20  ;;  %v285_v30 = vadd.f32 %v281_v16, %v276_v21  ;;  %v286_v31 = vadd.f32 %v281_v16, %v277_v22  ;;  %v287_v33 = vadd.f32 %v281_v16, %v278_v24 }
  0x20   : > { %v288_v34 = vadd.f32 %v281_v16, %v279_v25  ;;  %v289_v35 = vadd.f32 %v281_v16, %v280_v27  ;;  %v290_v36 = vpack.c.bf16 %v283_v28, %v282_v26  ;;  %v391_v43 = vadd.s32 16, %v389_v41 }
  0x21   : > { %345 = vmatpush.bf16.msra.mxu0 %v642_v23  ;;  %670 = vmatpush.bf16.msra.mxu1 %v642_v23  ;;  %v291_v37 = vpack.c.bf16 %v285_v30, %v284_v29  ;;  %v292_v38 = vpack.c.bf16 %v287_v33, %v286_v31  ;;  %v398_v44 = vadd.s32 %v397_v42, %v389_v41  ;;  %v390_v45 = vadd.s32 8, %v389_v41 }
  0x22   : > { %671 = vmatpush.bf16.msra.mxu2 %v642_v23  ;;  %672 = vmatpush.bf16.msra.mxu3 %v642_v23  ;;  %v293_v39 = vpack.c.bf16 %v289_v35, %v288_v34  ;;  %v392_v46 = vadd.s32 24, %v389_v41  ;;  %v400_v51 = vadd.s32 %v397_v42, %v391_v43  ;;  %v393_v52 = vadd.s32 32, %v389_v41 }
  0x23   : > { %vm406_vm3 = vcmp.lt.s32.totalorder %v398_v44, 200  ;;  %v395_v53 = vadd.s32 48, %v389_v41  ;;  %v399_v54 = vadd.s32 %v397_v42, %v390_v45  ;;  %v394_v56 = vadd.s32 40, %v389_v41 }
  0x24   : > { %v401_v55 = vadd.s32 %v397_v42, %v392_v46  ;;  %vm408_vm4 = vcmp.lt.s32.totalorder %v400_v51, 200  ;;  %v402_v57 = vadd.s32 %v397_v42, %v393_v52  ;;  %v396_v58 = vadd.s32 56, %v389_v41 }
  0x25   : > { %346 = vmatpush.bf16.msra.mxu0 %v641_v32  ;;  %673 = vmatpush.bf16.msra.mxu1 %v641_v32  ;;  %v404_v62 = vadd.s32 %v397_v42, %v395_v53  ;;  %vm407_vm6 = vcmp.lt.s32.totalorder %v399_v54, 200  ;;  %v403_v4 = vadd.s32 %v397_v42, %v394_v56  ;;  %vm489_vm12 = vcmask 1040384  }
  0x26   : > { %674 = vmatpush.bf16.msra.mxu2 %v641_v32  ;;  %675 = vmatpush.bf16.msra.mxu3 %v641_v32  ;;  %vm409_vm7 = vcmp.lt.s32.totalorder %v401_v55, 200  ;;  %vm410_vm8 = vcmp.lt.s32.totalorder %v402_v57, 200  ;;  %v405_v6 = vadd.s32 %v397_v42, %v396_v58  ;;  %vm493_vm13 = vcmask 254976  }
  0x27   : > { %vm412_vm9 = vcmp.lt.s32.totalorder %v404_v62, 200  ;;  %vm411_vm10 = vcmp.lt.s32.totalorder %v403_v4, 200  ;;  %v491_v4 = vld [vmem:[%s819_s29] sm:$0x3] }
  0x28   : > { %633 = vmatmul.msk.bf16.vlgmr.msra.gmra.mxu0 %vm326_vm1, %v290_v36  ;;  %634 = vmatmul.msk.bf16.vlgmr.msra.gmra.mxu1 %vm326_vm1, %v291_v37  ;;  %vm413_vm11 = vcmp.lt.s32.totalorder %v405_v6, 200 }
  0x29   : > { %635 = vmatmul.msk.bf16.vlgmr.msra.gmra.mxu2 %vm326_vm1, %v292_v38  ;;  %636 = vmatmul.msk.bf16.vlgmr.msra.gmra.mxu3 %vm326_vm1, %v293_v39 }
  0xa5   : > { %v348_v47 = vpop.f32.mrf.mxu0  ;;  %v353_v48 = vpop.f32.mrf.mxu1 }
  0xa6   : > { %v368_v49 = vpack.c.bf16 %v348_v47, %v348_v47  ;;  %v370_v50 = vpack.c.bf16 %v353_v48, %v353_v48  ;;  %v430_v59 = vsel %vm406_vm3, %v348_v47, 0.0  ;;  %v432_v63 = vsel %vm408_vm4, %v353_v48, 0.0 }
  0xa7   : > { %v460_v5 = vmul.f32 %v430_v59, %v430_v59  ;;  %v439_v11 = vsel %vm438_vm5, %v430_v59, 0.0  ;;  %v462_v12 = vmul.f32 %v432_v63, %v432_v63  ;;  %v442_v18 = vsel %vm438_vm5, %v432_v63, 0.0 }
  0xa8   : > { %377 = vst.msk [vmem:[%s827_s9] sm:$0xf] %vm376_vm2, %v368_v49 }
  0xa9   : > { %379 = vst.msk [vmem:[%s827_s9 + $0x8] sm:$0xf] %vm376_vm2, %v370_v50  ;;  %v468_v17 = vsel %vm438_vm5, %v460_v5, 0.0  ;;  %v471_v23 = vsel %vm438_vm5, %v462_v12, 0.0 }
  0xac   : > { %v358_v60 = vpop.f32.mrf.mxu2  ;;  %v363_v61 = vpop.f32.mrf.mxu3 }
  0xad   : > { %v372_v0 = vpack.c.bf16 %v358_v60, %v358_v60  ;;  %v374_v1 = vpack.c.bf16 %v363_v61, %v363_v61  ;;  %v350_v2 = vpop.f32.mrf.mxu0  ;;  %v355_v3 = vpop.f32.mrf.mxu1  ;;  %v434_v15 = vsel %vm410_vm8, %v358_v60, 0.0  ;;  %v436_v25 = vsel %vm412_vm9, %v363_v61, 0.0 }
  0xae   : > { %v369_v7 = vpack.c.bf16 %v350_v2, %v350_v2  ;;  %v431_v8 = vsel %vm407_vm6, %v350_v2, 0.0  ;;  %v371_v9 = vpack.c.bf16 %v355_v3, %v355_v3  ;;  %v433_v10 = vsel %vm409_vm7, %v355_v3, 0.0 }
  0xaf   : > { %381 = vst.msk [vmem:[%s827_s9 + $0x10] sm:$0xf] %vm376_vm2, %v372_v0  ;;  %v440_v13 = vsel %vm438_vm5, %v431_v8, 0.0  ;;  %v461_v14 = vmul.f32 %v431_v8, %v431_v8  ;;  %v463_v20 = vmul.f32 %v433_v10, %v433_v10  ;;  %v464_v24 = vmul.f32 %v434_v15, %v434_v15 }
  0xb0   : > { %383 = vst.msk [vmem:[%s827_s9 + $0x18] sm:$0xf] %vm376_vm2, %v374_v1  ;;  %v441_v16 = vadd.f32 %v440_v13, %v439_v11  ;;  %v444_v26 = vsel %vm438_vm5, %v433_v10, 0.0  ;;  %v446_v33 = vsel %vm438_vm5, %v434_v15, 0.0  ;;  %v466_v41 = vmul.f32 %v436_v25, %v436_v25 }
  0xb1   : > { %378 = vst.msk [vmem:[%s827_s9 + $0x4] sm:$0xf] %vm376_vm2, %v369_v7  ;;  %v469_v19 = vsel %vm438_vm5, %v461_v14, 0.0  ;;  %v473_v34 = vsel %vm438_vm5, %v463_v20, 0.0  ;;  %v475_v40 = vsel %vm438_vm5, %v464_v24, 0.0  ;;  %v450_v45 = vsel %vm438_vm5, %v436_v25, 0.0 }
  0xb2   : > { %380 = vst.msk [vmem:[%s827_s9 + $0xc] sm:$0xf] %vm376_vm2, %v371_v9  ;;  %v470_v21 = vadd.f32 %v469_v19, %v468_v17  ;;  %v443_v22 = vadd.f32 %v442_v18, %v441_v16  ;;  %v479_v50 = vsel %vm438_vm5, %v466_v41, 0.0 }
  0xb4   : > { %v360_v27 = vpop.f32.mrf.mxu2  ;;  %v365_v28 = vpop.f32.mrf.mxu3  ;;  %v445_v29 = vadd.f32 %v444_v26, %v443_v22  ;;  %v472_v30 = vadd.f32 %v471_v23, %v470_v21 }
  0xb5   : > { %v373_v31 = vpack.c.bf16 %v360_v27, %v360_v27  ;;  %v435_v32 = vsel %vm411_vm10, %v360_v27, 0.0  ;;  %v375_v36 = vpack.c.bf16 %v365_v28, %v365_v28  ;;  %v437_v39 = vsel %vm413_vm11, %v365_v28, 0.0 }
  0xb6   : > { %v465_v35 = vmul.f32 %v435_v32, %v435_v32  ;;  %v474_v37 = vadd.f32 %v473_v34, %v472_v30  ;;  %v447_v38 = vadd.f32 %v446_v33, %v445_v29  ;;  %v448_v42 = vsel %vm438_vm5, %v435_v32, 0.0 }
  0xb7   : > { %382 = vst.msk [vmem:[%s827_s9 + $0x14] sm:$0xf] %vm376_vm2, %v373_v31  ;;  %v467_v47 = vmul.f32 %v437_v39, %v437_v39  ;;  %v452_v51 = vsel %vm438_vm5, %v437_v39, 0.0 }
  0xb8   : > { %384 = vst.msk [vmem:[%s827_s9 + $0x1c] sm:$0xf] %vm376_vm2, %v375_v36  ;;  %v449_v43 = vadd.f32 %v448_v42, %v447_v38  ;;  %v476_v44 = vadd.f32 %v475_v40, %v474_v37  ;;  %v477_v46 = vsel %vm438_vm5, %v465_v35, 0.0 }
  0xb9   : > { %v481_v54 = vsel %vm438_vm5, %v467_v47, 0.0 }
  0xba   : > { %v478_v48 = vadd.f32 %v477_v46, %v476_v44  ;;  %v451_v49 = vadd.f32 %v450_v45, %v449_v43 }
  0xbc   : > { %v453_v52 = vadd.f32 %v452_v51, %v451_v49  ;;  %v480_v53 = vadd.f32 %v479_v50, %v478_v48 }
  0xbe   : > { %v454_v55 = vrot.slane %v453_v52, 4  ;;  %v482_v56 = vadd.f32 %v481_v54, %v480_v53 }
  0xc0   : > { %v455_v57 = vadd.f32 %v454_v55, %v453_v52  ;;  %v483_v58 = vrot.slane %v482_v56, 4 }
  0xc2   : > { %v456_v59 = vrot.slane %v455_v57, 2  ;;  %v484_v60 = vadd.f32 %v483_v58, %v482_v56 }
  0xc4   : > { %v457_v61 = vadd.f32 %v456_v59, %v455_v57  ;;  %v485_v62 = vrot.slane %v484_v60, 2 }
  0xc6   : > { %v458_v63 = vrot.slane %v457_v61, 1  ;;  %v486_v0 = vadd.f32 %v485_v62, %v484_v60 }
  0xc8   : > { %v487_v1 = vrot.slane %v486_v0, 1  ;;  %v459_v2 = vadd.f32 %v458_v63, %v457_v61 }
  0xca   : > { %v488_v3 = vadd.f32 %v487_v1, %v486_v0 }
  0xcc   : > { %v490_v5 = vsel %vm489_vm12, %v459_v2, %v488_v3 }
  0xcd   : > { %v492_v6 = vadd.f32 %v491_v4, %v490_v5 }
  0xcf   : > { %494 = vst.msk [vmem:[%s819_s29] sm:$0x3] %vm493_vm13, %v492_v6 }
  0xd0 PF: > { %s15_s19 = sadd.s32 1, %s755_s19   ;;  %s902_s15 = smov %s747_s17 }
  0xd1   : > { %p12_p8 = scmp.ge.s32.totalorder %s15_s19, 6   ;;  %s903_s16 = smov %s751_s18 }
  0xd2   : > { %s904_s17 = smov %s907_s20  ;;  %s905_s18 = smov %s911_s21 }
  0xd3   :  { %14 = sbr.rel (!%p12_p8) target bundleno = 3 (0x3), region = 78 }

// kernel: nffm_forward.2
= control target key start
LH: loop header
LB: loop body
LE: loop exit
PB: predicated region body
PF: predicated region fallthrough
CT: control target
= control target key end

     0   :  { %s1558_s12 = smov 0   ;;  %s1560_s13 = smov 0   ;;  %s1860_s0 = inlined_call_operand.vmem [shape: bf16[256,688], index: 0, kind: input, shape index: {}]   ;;  %s1861_s1 = inlined_call_operand.vmem [shape: bf16[688,64], index: 1, kind: input, shape index: {}]   ;;  %s1862_s2 = inlined_call_operand.vmem [shape: bf16[256,64], index: 2, kind: output, shape index: {0}]   ;;  %s1863_s3 = inlined_call_operand.vmem [shape: f32[2,2,64], index: 3, kind: output, shape index: {1}]  }
   0x1   :  { %s1562_s14 = smov 0   ;;  %s1564_s15 = smov 0  }
   0x2   :  { %s1566_s16 = smov 0  }
   0x3 LB: > { %s23_s17 = sadd.s32 1, %s1527_s14  ;;  %s26_s18 = sadd.s32 1, %s1531_s15  ;;  %s1535_s16 = sphi %s1566_s16, %s14_s16   ;;  %s1531_s15 = sphi %s1564_s15, %s1867_s15   ;;  %s1527_s14 = sphi %s1562_s14, %s1866_s14   ;;  %s1523_s13 = sphi %s1560_s13, %s1865_s13   ;;  %s1519_s12 = sphi %s1558_s12, %s1864_s12  }
   0x4   : > { %p24_p0 = scmp.ge.s32.totalorder %s23_s17, 2  ;;  %p1089_p1 = scmp.ge.s32.totalorder %s1535_s16, 1 }
   0x5   : > { %p166_p2 = scmp.lt.s32.totalorder %s1535_s16, 5 }
   0x6   : > { %s1869_s17 = smov (%p24_p0, %s23_s17), 0  ;;  %s1871_s18 = smov (!%p24_p0, %s26_s18), %s1531_s15 }
   0x7   : > { %p167_p3 = pnand %p1089_p1, %p166_p2  ;;  %p28_p4 = scmp.ge.s32.totalorder %s1871_s18, 2 }
   0x8   : > { %s1090_s19 = sshll.u32 (!%p167_p3), %s1523_s13, 1  ;;  %p220_p5 = scmp.lt.s32.totalorder (!%p167_p3), %s1523_s13, 1 }
   0x9   : > { %s1873_s18 = smov (%p28_p4, %s1871_s18), 0  ;;  %170 = sbr.rel (%p167_p3) target bundleno = 306 (0x132), region = 28 }
   0xa   : > { %s200_s20 = sadd.s32 (!%p167_p3), %s1519_s12, %s1090_s19  ;;  %p1097_p7 = scmp.ne.s32.totalorder (!%p167_p3), %s1519_s12, 0 }
   0xb   : > { %s1091_s21 = sshll.u32 (!%p167_p3), %s200_s20, 3 }
   0xc   : > { %p202_p6 = scmp.lt.s32.totalorder (!%p167_p3), %s1091_s21, 31 }
   0xe   : > { %s1875_s13 = smov (!%p220_p5, %s1523_s13), 1  ;;  %s1877_s21 = smov (!%p202_p6, %s1091_s21), 31 }
   0xf   : > { %s1096_s22 = sshll.u32 %s1875_s13, 1  ;;  %s1455_s23 = smul.u32 24, %s1877_s21 }
  0x10   : > { %s1095_s24 = sshll.u32 %s1877_s21, 2  ;;  %s1599_s30 = scalar_lea.vmem %s1863_s3, %s1096_s22 }
  0x11   : > { %s1594_s27 = scalar_lea.vmem %s1862_s2, %s1095_s24  ;;  %s1604_s6 = scalar_lea.vmem %s1860_s0, %s1455_s23 }
  0x12   : > { %228 = sbr.rel (%p1097_p7) target bundleno = 25 (0x19), region = 32 }
  0x17   : > { %vm229_vm0 = vcmask 517120   ;;  %v1537_v0 = vmov 0.0  }
  0x18   : > { %230 = vst.msk [vmem:[%s1599_s30] sm:$0x3] %vm229_vm0, %v1537_v0 }
  0x19 PF: > { %v1403_v1 = vld [vmem:[%s1861_s1 + $0x38] sm:$0xff]  ;;  %v1402_v3 = vld [vmem:[%s1861_s1 + $0x30] sm:$0xff]  ;;  %v1401_v5 = vld [vmem:[%s1861_s1 + $0x28] sm:$0xff]  ;;  %vm715_vm1 = vcmask 392192   ;;  %vm910_vm2 = vcmask 519168   ;;  %vm919_vm3 = vcmask 523264  }
  0x1a   : > { %v1411_v2 = vld [vmem:[%s1861_s1 + $0x78] sm:$0xff]  ;;  %1439 = vmatpush.bf16.msra.mxu2 %v1403_v1  ;;  %v1410_v4 = vld [vmem:[%s1861_s1 + $0x70] sm:$0xff]  ;;  %728 = vmatpush.bf16.msra.mxu0 %v1403_v1  ;;  %v1409_v6 = vld [vmem:[%s1861_s1 + $0x68] sm:$0xff]  ;;  %vm970_vm4 = vcmask 1040384   ;;  %vm974_vm5 = vcmask 517120  }
  0x1b   : > { %1447 = vmatpush.bf16.msra.mxu3 %v1411_v2  ;;  %757 = vmatpush.bf16.msra.mxu1 %v1411_v2  ;;  %v1400_v7 = vld [vmem:[%s1861_s1 + $0x20] sm:$0xff]  ;;  %v1399_v9 = vld [vmem:[%s1861_s1 + $0x18] sm:$0xff]  ;;  %v1398_v11 = vld [vmem:[%s1861_s1 + $0x10] sm:$0xff] }
  0x1c   : > { %v1408_v8 = vld [vmem:[%s1861_s1 + $0x60] sm:$0xff]  ;;  %v1407_v10 = vld [vmem:[%s1861_s1 + $0x58] sm:$0xff]  ;;  %v1406_v12 = vld [vmem:[%s1861_s1 + $0x50] sm:$0xff] }
  0x1d   : > { %v1397_v13 = vld [vmem:[%s1861_s1 + $0x8] sm:$0xff]  ;;  %v1396_v15 = vld [vmem:[%s1861_s1] sm:$0xff]  ;;  %v1387_v18 = vld [vmem:[%s1604_s6 + $0x74] sm:$0xf0] }
  0x1e   : > { %1440 = vmatpush.bf16.msra.mxu2 %v1402_v3  ;;  %729 = vmatpush.bf16.msra.mxu0 %v1402_v3  ;;  %v1405_v14 = vld [vmem:[%s1861_s1 + $0x48] sm:$0xff]  ;;  %v1404_v16 = vld [vmem:[%s1861_s1 + $0x40] sm:$0xff]  ;;  %v1150_v20 = vld [vmem:[%s1604_s6 + $0x78] sm:$0xf0] }
  0x1f   : > { %1448 = vmatpush.bf16.msra.mxu3 %v1410_v4  ;;  %758 = vmatpush.bf16.msra.mxu1 %v1410_v4  ;;  %v1148_v17 = vld [vmem:[%s1604_s6 + $0x60] sm:$0xf]  ;;  %v1384_v19 = vld [vmem:[%s1604_s6 + $0x64] sm:$0xf]  ;;  %v1375_v22 = vld [vmem:[%s1604_s6 + $0x14] sm:$0xf0] }
  0x20   : > { %v1100_v21 = vld [vmem:[%s1604_s6] sm:$0xf]  ;;  %v1372_v23 = vld [vmem:[%s1604_s6 + $0x4] sm:$0xf]  ;;  %v1102_v24 = vld [vmem:[%s1604_s6 + $0x18] sm:$0xf0]  ;;  %v1149_v27 = vor.u32 %v1387_v18, %v1148_v17  ;;  %v1153_v28 = vor.u32 %v1384_v19, %v1150_v20 }
  0x21   : > { %v1419_v25 = vld [vmem:[%s1861_s1 + $0xb8] sm:$0xff]  ;;  %v1101_v29 = vor.u32 %v1375_v22, %v1100_v21  ;;  %v1105_v30 = vor.u32 %v1372_v23, %v1102_v24  ;;  %v1438_v32 = vld [vmem:[%s1861_s1 + $0x150] sm:$0xff]  ;;  %v1437_v36 = vld [vmem:[%s1861_s1 + $0x148] sm:$0xff] }
  0x22   : > { %1441 = vmatpush.bf16.msra.mxu2 %v1401_v5  ;;  %730 = vmatpush.bf16.msra.mxu0 %v1401_v5  ;;  %v1427_v26 = vld [vmem:[%s1861_s1 + $0xf8] sm:$0xff]  ;;  %v1418_v33 = vld [vmem:[%s1861_s1 + $0xb0] sm:$0xff]  ;;  %v1417_v37 = vld [vmem:[%s1861_s1 + $0xa8] sm:$0xff] }
  0x23   : > { %1449 = vmatpush.bf16.msra.mxu3 %v1409_v6  ;;  %759 = vmatpush.bf16.msra.mxu1 %v1409_v6  ;;  %v1435_v31 = vld [vmem:[%s1861_s1 + $0x138] sm:$0xff]  ;;  %v1426_v34 = vld [vmem:[%s1861_s1 + $0xf0] sm:$0xff]  ;;  %v1425_v38 = vld [vmem:[%s1861_s1 + $0xe8] sm:$0xff] }
  0x24   : > { %v1434_v35 = vld [vmem:[%s1861_s1 + $0x130] sm:$0xff]  ;;  %v1433_v39 = vld [vmem:[%s1861_s1 + $0x128] sm:$0xff]  ;;  %v1436_v40 = vld [vmem:[%s1861_s1 + $0x140] sm:$0xff] }
  0x25   : > { %v1416_v41 = vld [vmem:[%s1861_s1 + $0xa0] sm:$0xff]  ;;  %v1172_v44 = vld [vmem:[%s1604_s6 + $0x90] sm:$0xf]  ;;  %v1393_v45 = vld [vmem:[%s1604_s6 + $0xa4] sm:$0xf0] }
  0x26   : > { %1442 = vmatpush.bf16.msra.mxu2 %v1400_v7  ;;  %731 = vmatpush.bf16.msra.mxu0 %v1400_v7  ;;  %v1424_v42 = vld [vmem:[%s1861_s1 + $0xe0] sm:$0xff]  ;;  %v1390_v46 = vld [vmem:[%s1604_s6 + $0x94] sm:$0xf]  ;;  %v1174_v47 = vld [vmem:[%s1604_s6 + $0xa8] sm:$0xf0]  ;;  %v1173_v54 = vor.u32 %v1393_v45, %v1172_v44 }
  0x27   : > { %1450 = vmatpush.bf16.msra.mxu3 %v1408_v8  ;;  %760 = vmatpush.bf16.msra.mxu1 %v1408_v8  ;;  %v1432_v43 = vld [vmem:[%s1861_s1 + $0x120] sm:$0xff]  ;;  %v1124_v48 = vld [vmem:[%s1604_s6 + $0x30] sm:$0xf]  ;;  %v1381_v49 = vld [vmem:[%s1604_s6 + $0x44] sm:$0xf0]  ;;  %v1177_v55 = vor.u32 %v1390_v46, %v1174_v47 }
  0x28   : > { %v1378_v50 = vld [vmem:[%s1604_s6 + $0x34] sm:$0xf]  ;;  %v1126_v51 = vld [vmem:[%s1604_s6 + $0x48] sm:$0xf0]  ;;  %v1415_v52 = vld [vmem:[%s1861_s1 + $0x98] sm:$0xff]  ;;  %v1125_v56 = vor.u32 %v1381_v49, %v1124_v48 }
  0x29   : > { %v1423_v53 = vld [vmem:[%s1861_s1 + $0xd8] sm:$0xff]  ;;  %v1129_v57 = vor.u32 %v1378_v50, %v1126_v51  ;;  %v1414_v59 = vld [vmem:[%s1861_s1 + $0x90] sm:$0xff]  ;;  %v1413_v62 = vld [vmem:[%s1861_s1 + $0x88] sm:$0xff] }
  0x2a   : > { %1443 = vmatpush.bf16.msra.mxu2 %v1399_v9  ;;  %732 = vmatpush.bf16.msra.mxu0 %v1399_v9  ;;  %v1431_v58 = vld [vmem:[%s1861_s1 + $0x118] sm:$0xff]  ;;  %v1422_v60 = vld [vmem:[%s1861_s1 + $0xd0] sm:$0xff]  ;;  %v1421_v63 = vld [vmem:[%s1861_s1 + $0xc8] sm:$0xff] }
  0x2b   : > { %1451 = vmatpush.bf16.msra.mxu3 %v1407_v10  ;;  %761 = vmatpush.bf16.msra.mxu1 %v1407_v10  ;;  %v1430_v61 = vld [vmem:[%s1861_s1 + $0x110] sm:$0xff]  ;;  %v1429_v0 = vld [vmem:[%s1861_s1 + $0x108] sm:$0xff]  ;;  %v1412_v1 = vld [vmem:[%s1861_s1 + $0x80] sm:$0xff] }
  0x2c   : > { %v1420_v2 = vld [vmem:[%s1861_s1 + $0xc0] sm:$0xff]  ;;  %v1108_v4 = vld [vmem:[%s1604_s6 + $0x8] sm:$0xf]  ;;  %v1373_v6 = vld [vmem:[%s1604_s6 + $0xc] sm:$0xf] }
  0x2d   : > { %v1428_v3 = vld [vmem:[%s1861_s1 + $0x100] sm:$0xff]  ;;  %v1116_v8 = vld [vmem:[%s1604_s6 + $0x10] sm:$0xf]  ;;  %v1377_v9 = vld [vmem:[%s1604_s6 + $0x24] sm:$0xf0] }
  0x2e   : > { %1444 = vmatpush.bf16.msra.mxu2 %v1398_v11  ;;  %733 = vmatpush.bf16.msra.mxu0 %v1398_v11  ;;  %v1376_v5 = vld [vmem:[%s1604_s6 + $0x1c] sm:$0xf0]  ;;  %v1110_v7 = vld [vmem:[%s1604_s6 + $0x20] sm:$0xf0]  ;;  %v1374_v10 = vld [vmem:[%s1604_s6 + $0x14] sm:$0xf] }
  0x2f   : > { %1452 = vmatpush.bf16.msra.mxu3 %v1406_v12  ;;  %762 = vmatpush.bf16.msra.mxu1 %v1406_v12  ;;  %v1118_v11 = vld [vmem:[%s1604_s6 + $0x28] sm:$0xf0]  ;;  %v1109_v12 = vor.u32 %v1376_v5, %v1108_v4  ;;  %v1382_v17 = vld [vmem:[%s1604_s6 + $0x4c] sm:$0xf0]  ;;  %v1379_v18 = vld [vmem:[%s1604_s6 + $0x3c] sm:$0xf] }
  0x30   : > { %v1134_v19 = vld [vmem:[%s1604_s6 + $0x50] sm:$0xf0]  ;;  %v1140_v20 = vld [vmem:[%s1604_s6 + $0x40] sm:$0xf]  ;;  %v1383_v21 = vld [vmem:[%s1604_s6 + $0x54] sm:$0xf0] }
  0x31   : > { %v1380_v22 = vld [vmem:[%s1604_s6 + $0x44] sm:$0xf]  ;;  %v1142_v23 = vld [vmem:[%s1604_s6 + $0x58] sm:$0xf0]  ;;  %v1188_v44 = vld [vmem:[%s1604_s6 + $0xa0] sm:$0xf] }
  0x32   : > { %1445 = vmatpush.bf16.msra.mxu2 %v1397_v13  ;;  %734 = vmatpush.bf16.msra.mxu0 %v1397_v13  ;;  %v1113_v13 = vor.u32 %v1373_v6, %v1110_v7  ;;  %v1395_v45 = vld [vmem:[%s1604_s6 + $0xb4] sm:$0xf0]  ;;  %v1392_v46 = vld [vmem:[%s1604_s6 + $0xa4] sm:$0xf]  ;;  %v1190_v47 = vld [vmem:[%s1604_s6 + $0xb8] sm:$0xf0] }
  0x33   : > { %1453 = vmatpush.bf16.msra.mxu3 %v1405_v14  ;;  %763 = vmatpush.bf16.msra.mxu1 %v1405_v14  ;;  %v1117_v14 = vor.u32 %v1377_v9, %v1116_v8  ;;  %v1189_v50 = vor.u32 %v1395_v45, %v1188_v44  ;;  %v1193_v51 = vor.u32 %v1392_v46, %v1190_v47 }
  0x36   : > { %1446 = vmatpush.bf16.msra.mxu2 %v1396_v15  ;;  %735 = vmatpush.bf16.msra.mxu0 %v1396_v15  ;;  %v1121_v15 = vor.u32 %v1374_v10, %v1118_v11 }
  0x37   : > { %1454 = vmatpush.bf16.msra.mxu3 %v1404_v16  ;;  %764 = vmatpush.bf16.msra.mxu1 %v1404_v16  ;;  %v1132_v16 = vld [vmem:[%s1604_s6 + $0x38] sm:$0xf] }
  0x38   : > { %v1133_v24 = vor.u32 %v1382_v17, %v1132_v16 }
  0x39   : > { %746 = vmatmul.bf16.vlgmr.msra.gmra.mxu2 %v1149_v27  ;;  %736 = vmatmul.bf16.vlgmr.msra.gmra.mxu0 %v1101_v29  ;;  %v1145_v27 = vor.u32 %v1380_v22, %v1142_v23  ;;  %v1388_v29 = vld [vmem:[%s1604_s6 + $0x7c] sm:$0xf0] }
  0x3a   : > { %786 = vmatpush.bf16.msrb.mxu2 %v1419_v25  ;;  %775 = vmatmul.bf16.vlgmr.msra.gmra.mxu3 %v1153_v28  ;;  %v1137_v25 = vor.u32 %v1379_v18, %v1134_v19  ;;  %v1156_v28 = vld [vmem:[%s1604_s6 + $0x68] sm:$0xf] }
  0x3b   : > { %815 = vmatpush.bf16.msrb.mxu3 %v1427_v26  ;;  %765 = vmatmul.bf16.vlgmr.msra.gmra.mxu1 %v1105_v30  ;;  %v1141_v26 = vor.u32 %v1383_v21, %v1140_v20  ;;  %v1385_v30 = vld [vmem:[%s1604_s6 + $0x6c] sm:$0xf] }
  0x3c   : > { %844 = vmatpush.bf16.msrb.mxu0 %v1435_v31  ;;  %878 = vmatpush.bf16.msrb.mxu1 %v1438_v32  ;;  %v1158_v31 = vld [vmem:[%s1604_s6 + $0x80] sm:$0xf0]  ;;  %v1164_v32 = vld [vmem:[%s1604_s6 + $0x70] sm:$0xf] }
  0x3e   : > { %787 = vmatpush.bf16.msrb.mxu2 %v1418_v33  ;;  %v1389_v33 = vld [vmem:[%s1604_s6 + $0x84] sm:$0xf0] }
  0x3f   : > { %816 = vmatpush.bf16.msrb.mxu3 %v1426_v34  ;;  %v1386_v34 = vld [vmem:[%s1604_s6 + $0x74] sm:$0xf] }
  0x40   : > { %845 = vmatpush.bf16.msrb.mxu0 %v1434_v35  ;;  %879 = vmatpush.bf16.msrb.mxu1 %v1437_v36  ;;  %v1166_v35 = vld [vmem:[%s1604_s6 + $0x88] sm:$0xf0]  ;;  %v1157_v36 = vor.u32 %v1388_v29, %v1156_v28 }
  0x42   : > { %788 = vmatpush.bf16.msrb.mxu2 %v1417_v37  ;;  %v1161_v37 = vor.u32 %v1385_v30, %v1158_v31 }
  0x43   : > { %817 = vmatpush.bf16.msrb.mxu3 %v1425_v38  ;;  %v1165_v38 = vor.u32 %v1389_v33, %v1164_v32 }
  0x44   : > { %846 = vmatpush.bf16.msrb.mxu0 %v1433_v39  ;;  %880 = vmatpush.bf16.msrb.mxu1 %v1436_v40  ;;  %v1169_v39 = vor.u32 %v1386_v34, %v1166_v35  ;;  %v1180_v40 = vld [vmem:[%s1604_s6 + $0x98] sm:$0xf] }
  0x46   : > { %789 = vmatpush.bf16.msrb.mxu2 %v1416_v41  ;;  %v1394_v41 = vld [vmem:[%s1604_s6 + $0xac] sm:$0xf0] }
  0x47   : > { %818 = vmatpush.bf16.msrb.mxu3 %v1424_v42  ;;  %v1391_v42 = vld [vmem:[%s1604_s6 + $0x9c] sm:$0xf]  ;;  %v1181_v48 = vor.u32 %v1394_v41, %v1180_v40 }
  0x48   : > { %847 = vmatpush.bf16.msrb.mxu0 %v1432_v43  ;;  %v1182_v43 = vld [vmem:[%s1604_s6 + $0xb0] sm:$0xf0] }
  0x49   : > { %751 = vmatmul.bf16.gmra.mxu2 %v1173_v54  ;;  %741 = vmatmul.bf16.gmra.mxu0 %v1125_v56  ;;  %v1185_v49 = vor.u32 %v1391_v42, %v1182_v43 }
  0x4a   : > { %790 = vmatpush.bf16.msrb.mxu2 %v1415_v52  ;;  %780 = vmatmul.bf16.gmra.mxu3 %v1177_v55 }
  0x4b   : > { %819 = vmatpush.bf16.msrb.mxu3 %v1423_v53  ;;  %770 = vmatmul.bf16.gmra.mxu1 %v1129_v57 }
  0x4c   : > { %848 = vmatpush.bf16.msrb.mxu0 %v1431_v58 }
  0x4e   : > { %791 = vmatpush.bf16.msrb.mxu2 %v1414_v59 }
  0x4f   : > { %820 = vmatpush.bf16.msrb.mxu3 %v1422_v60 }
  0x50   : > { %849 = vmatpush.bf16.msrb.mxu0 %v1430_v61 }
  0x52   : > { %792 = vmatpush.bf16.msrb.mxu2 %v1413_v62 }
  0x53   : > { %821 = vmatpush.bf16.msrb.mxu3 %v1421_v63 }
  0x54   : > { %850 = vmatpush.bf16.msrb.mxu0 %v1429_v0 }
  0x56   : > { %793 = vmatpush.bf16.msrb.mxu2 %v1412_v1 }
  0x57   : > { %822 = vmatpush.bf16.msrb.mxu3 %v1420_v2 }
  0x58   : > { %851 = vmatpush.bf16.msrb.mxu0 %v1428_v3 }
  0x59   : > { %794 = vmatmul.bf16.vlgmr.msrb.gmra.mxu2 %v1109_v12 }
  0x5a   : > { %823 = vmatmul.bf16.vlgmr.msrb.gmra.mxu3 %v1113_v13 }
  0x5b   : > { %852 = vmatmul.bf16.vlgmr.msrb.gmra.mxu0 %v1117_v14  ;;  %1366 = vmatmul.msk.bf16.vlgmr.msrb.gmra.mxu1 %vm715_vm1, %v1121_v15 }
  0x69   : > { %799 = vmatmul.bf16.gmra.mxu2 %v1133_v24 }
  0x6a   : > { %828 = vmatmul.bf16.gmra.mxu3 %v1137_v25 }
  0x6b   : > { %857 = vmatmul.bf16.gmra.mxu0 %v1141_v26  ;;  %1367 = vmatmul.msk.bf16.gmra.mxu1 %vm715_vm1, %v1145_v27 }
  0x79   : > { %804 = vmatmul.bf16.gmra.mxu2 %v1157_v36 }
  0x7a   : > { %833 = vmatmul.bf16.gmra.mxu3 %v1161_v37 }
  0x7b   : > { %862 = vmatmul.bf16.gmra.mxu0 %v1165_v38  ;;  %1368 = vmatmul.msk.bf16.gmra.mxu1 %vm715_vm1, %v1169_v39 }
  0x89   : > { %809 = vmatmul.bf16.gmra.mxu2 %v1181_v48 }
  0x8a   : > { %838 = vmatmul.bf16.gmra.mxu3 %v1185_v49 }
  0x8b   : > { %867 = vmatmul.bf16.gmra.mxu0 %v1189_v50  ;;  %1369 = vmatmul.msk.bf16.gmra.mxu1 %vm715_vm1, %v1193_v51 }
  0xb6   : > { %v737_v52 = vpop.f32.mrf.mxu0 }
  0xb8   : > { %v766_v53 = vpop.f32.mrf.mxu1 }
  0xb9   : > { %v767_v6 = vadd.f32 %v766_v53, %v737_v52 }
  0xbc   : > { %v747_v54 = vpop.f32.mrf.mxu2 }
  0xbd   : > { %v776_v55 = vpop.f32.mrf.mxu3 }
  0xbe   : > { %v739_v56 = vpop.f32.mrf.mxu0  ;;  %v777_v43 = vadd.f32 %v776_v55, %v747_v54 }
  0xc0   : > { %v768_v57 = vpop.f32.mrf.mxu1 }
  0xc1   : > { %v769_v14 = vadd.f32 %v768_v57, %v739_v56 }
  0xc4   : > { %v1789_v58 = vpop.f32.mrf.mxu2 }
  0xc5   : > { %v778_v59 = vpop.f32.mrf.mxu3 }
  0xc6   : > { %v742_v60 = vpop.f32.mrf.mxu0  ;;  %v779_v52 = vadd.f32 %v778_v59, %v1789_v58 }
  0xc8   : > { %v771_v61 = vpop.f32.mrf.mxu1 }
  0xc9   : > { %v772_v24 = vadd.f32 %v771_v61, %v742_v60 }
  0xcc   : > { %v1791_v62 = vpop.f32.mrf.mxu2 }
  0xcd   : > { %v1793_v63 = vpop.f32.mrf.mxu3 }
  0xce   : > { %v744_v0 = vpop.f32.mrf.mxu0 }
  0xd0   : > { %v773_v1 = vpop.f32.mrf.mxu1 }
  0xd1   : > { %v774_v34 = vadd.f32 %v773_v1, %v744_v0 }
  0xd4   : > { %v1795_v2 = vpop.f32.mrf.mxu2 }
  0xd5   : > { %v1797_v3 = vpop.f32.mrf.mxu3 }
  0xd8   : > { %v853_v4 = vpop.f32.mrf.mxu0  ;;  %v882_v5 = vpop.f32.mrf.mxu1 }
  0xdc   : > { %v795_v7 = vpop.f32.mrf.mxu2 }
  0xdd   : > { %v824_v8 = vpop.f32.mrf.mxu3  ;;  %v796_v9 = vadd.f32 %v795_v7, %v767_v6 }
  0xdf   : > { %v825_v10 = vadd.f32 %v824_v8, %v796_v9 }
  0xe0   : > { %v855_v11 = vpop.f32.mrf.mxu0  ;;  %v884_v12 = vpop.f32.mrf.mxu1 }
  0xe1   : > { %v854_v13 = vadd.f32 %v853_v4, %v825_v10  ;;  %v782_v4 = vadd.f32 %v1793_v63, %v1791_v62 }
  0xe3   : > { %v1799_v15 = vadd.f32 %v882_v5, %v854_v13 }
  0xe4   : > { %v797_v16 = vpop.f32.mrf.mxu2 }
  0xe5   : > { %v826_v17 = vpop.f32.mrf.mxu3  ;;  %v902_v18 = vpack.c.bf16 %v1799_v15, %v1799_v15  ;;  %v798_v19 = vadd.f32 %v797_v16, %v769_v14  ;;  %v941_v9 = vmul.f32 %v1799_v15, %v1799_v15  ;;  %v920_v62 = vsel %vm919_vm3, %v1799_v15, 0.0 }
  0xe7   : > { %911 = vst.msk [vmem:[%s1594_s27] sm:$0xf] %vm910_vm2, %v902_v18  ;;  %v827_v20 = vadd.f32 %v826_v17, %v798_v19  ;;  %v784_v19 = vadd.f32 %v1797_v3, %v1795_v2 }
  0xe8   : > { %v858_v21 = vpop.f32.mrf.mxu0  ;;  %v887_v22 = vpop.f32.mrf.mxu1 }
  0xe9   : > { %v856_v23 = vadd.f32 %v855_v11, %v827_v20  ;;  %v949_v20 = vsel %vm919_vm3, %v941_v9, 0.0 }
  0xeb   : > { %v885_v25 = vadd.f32 %v884_v12, %v856_v23 }
  0xec   : > { %v800_v26 = vpop.f32.mrf.mxu2 }
  0xed   : > { %v829_v27 = vpop.f32.mrf.mxu3  ;;  %v903_v28 = vpack.c.bf16 %v885_v25, %v885_v25  ;;  %v801_v29 = vadd.f32 %v800_v26, %v772_v24  ;;  %v942_v8 = vmul.f32 %v885_v25, %v885_v25  ;;  %v921_v11 = vsel %vm919_vm3, %v885_v25, 0.0 }
  0xef   : > { %912 = vst.msk [vmem:[%s1594_s27 + $0x4] sm:$0xf] %vm910_vm2, %v903_v28  ;;  %v830_v30 = vadd.f32 %v829_v27, %v801_v29  ;;  %v950_v63 = vsel %vm919_vm3, %v942_v8, 0.0 }
  0xf0   : > { %v860_v31 = vpop.f32.mrf.mxu0  ;;  %v889_v33 = vpop.f32.mrf.mxu1  ;;  %v951_v26 = vadd.f32 %v950_v63, %v949_v20 }
  0xf1   : > { %v859_v32 = vadd.f32 %v858_v21, %v830_v30  ;;  %v922_v21 = vadd.f32 %v921_v11, %v920_v62 }
  0xf3   : > { %v888_v35 = vadd.f32 %v887_v22, %v859_v32 }
  0xf4   : > { %v802_v36 = vpop.f32.mrf.mxu2 }
  0xf5   : > { %v831_v37 = vpop.f32.mrf.mxu3  ;;  %v904_v38 = vpack.c.bf16 %v888_v35, %v888_v35  ;;  %v803_v39 = vadd.f32 %v802_v36, %v774_v34  ;;  %v943_v12 = vmul.f32 %v888_v35, %v888_v35  ;;  %v923_v17 = vsel %vm919_vm3, %v888_v35, 0.0 }
  0xf6   : > { %v924_v15 = vadd.f32 %v923_v17, %v922_v21 }
  0xf7   : > { %913 = vst.msk [vmem:[%s1594_s27 + $0x8] sm:$0xf] %vm910_vm2, %v904_v38  ;;  %v832_v40 = vadd.f32 %v831_v37, %v803_v39  ;;  %v952_v22 = vsel %vm919_vm3, %v943_v12, 0.0 }
  0xf8   : > { %v863_v42 = vpop.f32.mrf.mxu0  ;;  %v892_v45 = vpop.f32.mrf.mxu1  ;;  %v953_v3 = vadd.f32 %v952_v22, %v951_v26 }
  0xf9   : > { %v861_v41 = vadd.f32 %v860_v31, %v832_v40 }
  0xfb   : > { %v890_v44 = vadd.f32 %v889_v33, %v861_v41 }
  0xfc   : > { %v805_v46 = vpop.f32.mrf.mxu2 }
  0xfd   : > { %v834_v47 = vpop.f32.mrf.mxu3  ;;  %v905_v48 = vpack.c.bf16 %v890_v44, %v890_v44  ;;  %v806_v49 = vadd.f32 %v805_v46, %v777_v43  ;;  %v944_v14 = vmul.f32 %v890_v44, %v890_v44  ;;  %v925_v23 = vsel %vm919_vm3, %v890_v44, 0.0 }
  0xfe   : > { %v926_v32 = vadd.f32 %v925_v23, %v924_v15 }
  0xff   : > { %914 = vst.msk [vmem:[%s1594_s27 + $0xc] sm:$0xf] %vm910_vm2, %v905_v48  ;;  %v835_v50 = vadd.f32 %v834_v47, %v806_v49  ;;  %v954_v27 = vsel %vm919_vm3, %v944_v14, 0.0 }
 0x100   : > { %v865_v56 = vpop.f32.mrf.mxu0  ;;  %v894_v54 = vpop.f32.mrf.mxu1  ;;  %v955_v38 = vadd.f32 %v954_v27, %v953_v3 }
 0x101   : > { %v864_v51 = vadd.f32 %v863_v42, %v835_v50 }
 0x103   : > { %v893_v53 = vadd.f32 %v892_v45, %v864_v51 }
 0x104   : > { %v807_v57 = vpop.f32.mrf.mxu2 }
 0x105   : > { %v836_v60 = vpop.f32.mrf.mxu3  ;;  %v906_v61 = vpack.c.bf16 %v893_v53, %v893_v53  ;;  %v808_v0 = vadd.f32 %v807_v57, %v779_v52  ;;  %v945_v24 = vmul.f32 %v893_v53, %v893_v53  ;;  %v927_v29 = vsel %vm919_vm3, %v893_v53, 0.0 }
 0x106   : > { %v928_v39 = vadd.f32 %v927_v29, %v926_v32 }
 0x107   : > { %915 = vst.msk [vmem:[%s1594_s27 + $0x10] sm:$0xf] %vm910_vm2, %v906_v61  ;;  %v837_v55 = vadd.f32 %v836_v60, %v808_v0  ;;  %v956_v34 = vsel %vm919_vm3, %v945_v24, 0.0 }
 0x108   : > { %v868_v10 = vpop.f32.mrf.mxu0  ;;  %v897_v16 = vpop.f32.mrf.mxu1  ;;  %v957_v44 = vadd.f32 %v956_v34, %v955_v38 }
 0x109   : > { %v866_v1 = vadd.f32 %v865_v56, %v837_v55 }
 0x10b   : > { %v895_v5 = vadd.f32 %v894_v54, %v866_v1 }
 0x10c   : > { %v810_v6 = vpop.f32.mrf.mxu2 }
 0x10d   : > { %v839_v7 = vpop.f32.mrf.mxu3  ;;  %v907_v58 = vpack.c.bf16 %v895_v5, %v895_v5  ;;  %v811_v59 = vadd.f32 %v810_v6, %v782_v4  ;;  %v946_v30 = vmul.f32 %v895_v5, %v895_v5  ;;  %v929_v35 = vsel %vm919_vm3, %v895_v5, 0.0 }
 0x10e   : > { %v930_v45 = vadd.f32 %v929_v35, %v928_v39 }
 0x10f   : > { %916 = vst.msk [vmem:[%s1594_s27 + $0x14] sm:$0xf] %vm910_vm2, %v907_v58  ;;  %v840_v13 = vadd.f32 %v839_v7, %v811_v59  ;;  %v958_v41 = vsel %vm919_vm3, %v946_v30, 0.0 }
 0x110   : > { %v870_v40 = vpop.f32.mrf.mxu0  ;;  %v899_v46 = vpop.f32.mrf.mxu1  ;;  %v959_v49 = vadd.f32 %v958_v41, %v957_v44 }
 0x111   : > { %v869_v18 = vadd.f32 %v868_v10, %v840_v13  ;;  %v972_v10 = vld [vmem:[%s1599_s30] sm:$0x3] }
 0x113   : > { %v898_v25 = vadd.f32 %v897_v16, %v869_v18 }
 0x114   : > { %v812_v28 = vpop.f32.mrf.mxu2 }
 0x115   : > { %v908_v31 = vpack.c.bf16 %v898_v25, %v898_v25  ;;  %v813_v2 = vadd.f32 %v812_v28, %v784_v19  ;;  %v841_v33 = vpop.f32.mrf.mxu3  ;;  %v947_v36 = vmul.f32 %v898_v25, %v898_v25  ;;  %v931_v42 = vsel %vm919_vm3, %v898_v25, 0.0 }
 0x116   : > { %v932_v50 = vadd.f32 %v931_v42, %v930_v45 }
 0x117   : > { %917 = vst.msk [vmem:[%s1594_s27 + $0x18] sm:$0xf] %vm910_vm2, %v908_v31  ;;  %v842_v37 = vadd.f32 %v841_v33, %v813_v2  ;;  %v960_v47 = vsel %vm919_vm3, %v947_v36, 0.0 }
 0x118   : > { %v961_v56 = vadd.f32 %v960_v47, %v959_v49 }
 0x119   : > { %v871_v43 = vadd.f32 %v870_v40, %v842_v37 }
 0x11b   : > { %v900_v48 = vadd.f32 %v899_v46, %v871_v43 }
 0x11d   : > { %v909_v51 = vpack.c.bf16 %v900_v48, %v900_v48  ;;  %v933_v52 = vsel %vm919_vm3, %v900_v48, 0.0  ;;  %v948_v53 = vmul.f32 %v900_v48, %v900_v48 }
 0x11e   : > { %v934_v57 = vadd.f32 %v933_v52, %v932_v50 }
 0x11f   : > { %918 = vst.msk [vmem:[%s1594_s27 + $0x1c] sm:$0xf] %vm910_vm2, %v909_v51  ;;  %v962_v60 = vsel %vm919_vm3, %v948_v53, 0.0 }
 0x120   : > { %v935_v61 = vrot.slane %v934_v57, 4  ;;  %v963_v0 = vadd.f32 %v962_v60, %v961_v56 }
 0x122   : > { %v936_v54 = vadd.f32 %v935_v61, %v934_v57  ;;  %v964_v55 = vrot.slane %v963_v0, 4 }
 0x124   : > { %v937_v1 = vrot.slane %v936_v54, 2  ;;  %v965_v4 = vadd.f32 %v964_v55, %v963_v0 }
 0x126   : > { %v938_v5 = vadd.f32 %v937_v1, %v936_v54  ;;  %v966_v6 = vrot.slane %v965_v4, 2 }
 0x128   : > { %v939_v7 = vrot.slane %v938_v5, 1  ;;  %v967_v8 = vadd.f32 %v966_v6, %v965_v4 }
 0x12a   : > { %v968_v58 = vrot.slane %v967_v8, 1  ;;  %v940_v59 = vadd.f32 %v939_v7, %v938_v5 }
 0x12c   : > { %v969_v9 = vadd.f32 %v968_v58, %v967_v8 }
 0x12e   : > { %v971_v11 = vsel %vm970_vm4, %v940_v59, %v969_v9 }
 0x12f   : > { %v973_v12 = vadd.f32 %v972_v10, %v971_v11 }
 0x131   : > { %975 = vst.msk [vmem:[%s1599_s30] sm:$0x3] %vm974_vm5, %v973_v12 }
 0x132 PF: > { %s14_s16 = sadd.s32 1, %s1535_s16   ;;  %s1864_s12 = smov %s1527_s14 }
 0x133   : > { %p11_p8 = scmp.ge.s32.totalorder %s14_s16, 6   ;;  %s1865_s13 = smov %s1531_s15 }
 0x134   : > { %s1866_s14 = smov %s1869_s17  ;;  %s1867_s15 = smov %s1873_s18 }
 0x135   :  { %13 = sbr.rel (!%p11_p8) target bundleno = 3 (0x3), region = 74 }

</bundles_post_ra>
